<compile_context>
chip_gen: v7x
topology: tpu7x:2x2x1
jax: 0.10.0
libtpu: 0.0.40
codegen_flags: <defaults>
</compile_context>

<pallas_src>
import functools

import numpy as np
import jax
import jax.numpy as jnp
from jax import lax
from jax.experimental import pallas as pl
from jax.experimental.pallas import tpu as pltpu


def _build_tap_masks(H, W):
    """(9, 1, H*W) f32 validity masks for the 9 taps of a pad=1 3x3 conv."""
    L = H * W
    yy, xx = np.meshgrid(np.arange(H), np.arange(W), indexing="ij")
    yy = yy.reshape(-1)
    xx = xx.reshape(-1)
    masks = []
    for dy in (-1, 0, 1):
        for dx in (-1, 0, 1):
            valid = ((yy + dy >= 0) & (yy + dy < H) &
                     (xx + dx >= 0) & (xx + dx < W))
            masks.append(valid.astype(np.float32))
    return np.stack(masks, axis=0).reshape(9, 1, L)


def _conv3x3_lrelu(a, w_taps, bias, masks, H, W):
    """3x3 conv (stride 1, pad 1) + LeakyReLU(0.1) in (channels, H*W) layout.

    a:      (C, L) f32 activations (spatial flattened on lanes).
    w_taps: (9, Cout, C) f32 weights, tap-major ((ky*3+kx), out, in).
    bias:   (Cout, 1) f32.
    masks:  (9, 1, L) f32 border-validity masks.
    """
    C, L = a.shape
    Cout = w_taps.shape[1]
    acc = jnp.zeros((Cout, L), jnp.float32)
    tap = 0
    for dy in (-1, 0, 1):
        for dx in (-1, 0, 1):
            s = dy * W + dx
            if s == 0:
                patch = a
            else:
                # rolled[c, i] = a[c, (i + s) % L]; mask zeroes wrapped borders.
                rolled = pltpu.roll(a, (-s) % L, 1)
                patch = rolled * masks[tap]
            acc = acc + jnp.dot(w_taps[tap], patch,
                                preferred_element_type=jnp.float32)
            tap += 1
    acc = acc + bias
    return jnp.where(acc >= 0.0, acc, 0.1 * acc)


def _downblock_kernel(x_ref, w1_ref, b1_ref, w2_ref, b2_ref, m_ref, o_ref,
                      *, H, W):
    # x_ref: (1, Cp, L)   w1_ref: (9, Cout, Cp)   b1_ref: (Cout, 1)
    # w2_ref: (9, Cout, Cout)   b2_ref: (Cout, 1)   m_ref: (9, 1, L)
    # o_ref: (1, Cout, L)
    x = x_ref[0]                     # (Cp, L)
    masks = m_ref[...]               # (9, 1, L)
    y1 = _conv3x3_lrelu(x, w1_ref[...], b1_ref[...], masks, H, W)
    y2 = _conv3x3_lrelu(y1, w2_ref[...], b2_ref[...], masks, H, W)
    o_ref[0] = y2.astype(o_ref.dtype)


@jax.jit
def downblock_forward(x_nchw, w1_oihw, b1, w2_oihw, b2):
    """x_nchw: (N, Cin, H, W) f32 -> (N, Cout, H, W) f32 (PyTorch semantics)."""
    N, Cin, H, W = x_nchw.shape
    Cout = w1_oihw.shape[0]
    L = H * W

    # Channels on sublanes / flattened spatial on lanes; pad Cin to a multiple
    # of 8 so all operands are (8,128)-tile aligned (zero channels are inert).
    Cp = -(-Cin // 8) * 8
    x = x_nchw.reshape(N, Cin, L)
    if Cp != Cin:
        x = jnp.pad(x, ((0, 0), (0, Cp - Cin), (0, 0)))

    # Tap-major weight slabs: [ (ky*3+kx), out_ch, in_ch ].
    w1_t = jnp.transpose(w1_oihw, (2, 3, 0, 1)).reshape(9, Cout, Cin)
    if Cp != Cin:
        w1_t = jnp.pad(w1_t, ((0, 0), (0, 0), (0, Cp - Cin)))
    w2_t = jnp.transpose(w2_oihw, (2, 3, 0, 1)).reshape(9, Cout, Cout)
    b1c = b1.reshape(Cout, 1)
    b2c = b2.reshape(Cout, 1)
    masks = jnp.asarray(_build_tap_masks(H, W))          # compile-time constant

    kernel = functools.partial(_downblock_kernel, H=H, W=W)
    out = pl.pallas_call(
        kernel,
        out_shape=jax.ShapeDtypeStruct((N, Cout, L), jnp.float32),
        grid_spec=pltpu.PrefetchScalarGridSpec(
            num_scalar_prefetch=0,
            grid=(N,),
            in_specs=[
                pl.BlockSpec((1, Cp, L), lambda n: (n, 0, 0)),
                pl.BlockSpec((9, Cout, Cp), lambda n: (0, 0, 0)),
                pl.BlockSpec((Cout, 1), lambda n: (0, 0)),
                pl.BlockSpec((9, Cout, Cout), lambda n: (0, 0, 0)),
                pl.BlockSpec((Cout, 1), lambda n: (0, 0)),
                pl.BlockSpec((9, 1, L), lambda n: (0, 0, 0)),
            ],
            out_specs=pl.BlockSpec((1, Cout, L), lambda n: (n, 0, 0)),
        ),
        compiler_params=pltpu.CompilerParams(
            dimension_semantics=("parallel",)),
    )(x, w1_t, b1c, w2_t, b2c, masks)

    return out.reshape(N, Cout, H, W)                    # free bitcast reshape


def _reference_forward(x_nchw, w1_oihw, b1, w2_oihw, b2):
    """Plain-JAX NCHW reference for correctness checking."""
    def conv_lrelu(x, w, b):
        y = lax.conv_general_dilated(
            x, w, window_strides=(1, 1), padding=((1, 1), (1, 1)),
            dimension_numbers=("NCHW", "OIHW", "NCHW"),
            precision=lax.Precision.HIGHEST)
        y = y + b[None, :, None, None]
        return jnp.where(y >= 0, y, 0.1 * y)

    return conv_lrelu(conv_lrelu(x_nchw, w1_oihw, b1), w2_oihw, b2)


if __name__ == "__main__":
    key = jax.random.PRNGKey(0)
    N, Cin, Cout, H, W = 2, 4, 8, 16, 16

    k_x, k_w1, k_b1, k_w2, k_b2 = jax.random.split(key, 5)
    x = jax.random.normal(k_x, (N, Cin, H, W), jnp.float32)

    # PyTorch Conv2d default init (uniform +-1/sqrt(fan_in)), OIHW layout.
    bound1 = 1.0 / (Cin * 9) ** 0.5
    w1 = jax.random.uniform(k_w1, (Cout, Cin, 3, 3), jnp.float32, -bound1, bound1)
    b1 = jax.random.uniform(k_b1, (Cout,), jnp.float32, -bound1, bound1)
    bound2 = 1.0 / (Cout * 9) ** 0.5
    w2 = jax.random.uniform(k_w2, (Cout, Cout, 3, 3), jnp.float32, -bound2, bound2)
    b2 = jax.random.uniform(k_b2, (Cout,), jnp.float32, -bound2, bound2)

    out = downblock_forward(x, w1, b1, w2, b2)
    jax.block_until_ready(out)

    ref = _reference_forward(x, w1, b1, w2, b2)
    assert out.shape == (N, Cout, H, W)
    assert jnp.allclose(out, ref, atol=1e-4, rtol=1e-4), "mismatch vs reference"

    print("KERNEL_OK")
</pallas_src>

<mosaic_0001>
module attributes {stable_mosaic.version = 11 : i64} {
  func.func @_downblock_kernel(%arg0: i32, %arg1: memref<1x8x256xf32, #tpu.memory_space<vmem>>, %arg2: memref<9x8x8xf32, #tpu.memory_space<vmem>>, %arg3: memref<8x1xf32, #tpu.memory_space<vmem>>, %arg4: memref<9x8x8xf32, #tpu.memory_space<vmem>>, %arg5: memref<8x1xf32, #tpu.memory_space<vmem>>, %arg6: memref<9x1x256xf32, #tpu.memory_space<vmem>>, %arg7: memref<1x8x256xf32, #tpu.memory_space<vmem>>) attributes {dimension_semantics = [#tpu.dimension_semantics<parallel>], iteration_bounds = array<i64: 2>, scalar_prefetch = 0 : i64, scratch_operands = 0 : i64, tpu.core_type = #tpu.core_type<tc>, window_params = [{transform_indices = @transform_0, window_bounds = array<i64: 1, 8, 256>}, {pipeline_mode = #tpu.pipeline_mode<synchronous>, transform_indices = @transform_1, window_bounds = array<i64: 9, 8, 8>}, {pipeline_mode = #tpu.pipeline_mode<synchronous>, transform_indices = @transform_2, window_bounds = array<i64: 8, 1>}, {pipeline_mode = #tpu.pipeline_mode<synchronous>, transform_indices = @transform_3, window_bounds = array<i64: 9, 8, 8>}, {pipeline_mode = #tpu.pipeline_mode<synchronous>, transform_indices = @transform_4, window_bounds = array<i64: 8, 1>}, {pipeline_mode = #tpu.pipeline_mode<synchronous>, transform_indices = @transform_5, window_bounds = array<i64: 9, 1, 256>}, {transform_indices = @transform_6, window_bounds = array<i64: 1, 8, 256>}]} {
    %c0 = arith.constant 0 : index
    %c0_0 = arith.constant 0 : index
    %c0_1 = arith.constant 0 : index
    %0 = vector.load %arg1[%c0, %c0_0, %c0_1] : memref<1x8x256xf32, #tpu.memory_space<vmem>>, vector<1x8x256xf32>
    %1 = vector.shape_cast %0 : vector<1x8x256xf32> to vector<8x256xf32>
    %c0_2 = arith.constant 0 : index
    %c0_3 = arith.constant 0 : index
    %c0_4 = arith.constant 0 : index
    %2 = vector.load %arg6[%c0_2, %c0_3, %c0_4] : memref<9x1x256xf32, #tpu.memory_space<vmem>>, vector<9x1x256xf32>
    %c0_5 = arith.constant 0 : index
    %c0_6 = arith.constant 0 : index
    %c0_7 = arith.constant 0 : index
    %3 = vector.load %arg2[%c0_5, %c0_6, %c0_7] : memref<9x8x8xf32, #tpu.memory_space<vmem>>, vector<9x8x8xf32>
    %c0_8 = arith.constant 0 : index
    %c0_9 = arith.constant 0 : index
    %4 = vector.load %arg3[%c0_8, %c0_9] : memref<8x1xf32, #tpu.memory_space<vmem>>, vector<8x1xf32>
    %cst = arith.constant 0.000000e+00 : f32
    %5 = vector.broadcast %cst : f32 to vector<8x256xf32>
    %c17_i32 = arith.constant 17 : i32
    %6 = tpu.dynamic_rotate %1 by %c17_i32 dim 1 : vector<8x256xf32>, i32 -> vector<8x256xf32>
    %7 = vector.extract_strided_slice %2 {offsets = [0, 0, 0], sizes = [1, 1, 256], strides = [1, 1, 1]} : vector<9x1x256xf32> to vector<1x1x256xf32>
    %8 = vector.shape_cast %7 : vector<1x1x256xf32> to vector<1x256xf32>
    %9 = vector.broadcast %8 : vector<1x256xf32> to vector<8x256xf32>
    %10 = arith.mulf %6, %9 : vector<8x256xf32>
    %11 = vector.extract_strided_slice %3 {offsets = [0, 0, 0], sizes = [1, 8, 8], strides = [1, 1, 1]} : vector<9x8x8xf32> to vector<1x8x8xf32>
    %12 = vector.shape_cast %11 : vector<1x8x8xf32> to vector<8x8xf32>
    %cst_10 = arith.constant dense<0.000000e+00> : vector<8x256xf32>
    %13 = tpu.matmul %12, %10, %cst_10 {dimension_numbers = #tpu.dot_dimension_numbers<[1], [0], [0], [1], [0, 0, 1, 1], [], []>} : vector<8x8xf32>, vector<8x256xf32>, vector<8x256xf32> -> vector<8x256xf32>
    %14 = arith.addf %5, %13 : vector<8x256xf32>
    %c16_i32 = arith.constant 16 : i32
    %15 = tpu.dynamic_rotate %1 by %c16_i32 dim 1 : vector<8x256xf32>, i32 -> vector<8x256xf32>
    %16 = vector.extract_strided_slice %2 {offsets = [1, 0, 0], sizes = [1, 1, 256], strides = [1, 1, 1]} : vector<9x1x256xf32> to vector<1x1x256xf32>
    %17 = vector.shape_cast %16 : vector<1x1x256xf32> to vector<1x256xf32>
    %18 = vector.broadcast %17 : vector<1x256xf32> to vector<8x256xf32>
    %19 = arith.mulf %15, %18 : vector<8x256xf32>
    %20 = vector.extract_strided_slice %3 {offsets = [1, 0, 0], sizes = [1, 8, 8], strides = [1, 1, 1]} : vector<9x8x8xf32> to vector<1x8x8xf32>
    %21 = vector.shape_cast %20 : vector<1x8x8xf32> to vector<8x8xf32>
    %cst_11 = arith.constant dense<0.000000e+00> : vector<8x256xf32>
    %22 = tpu.matmul %21, %19, %cst_11 {dimension_numbers = #tpu.dot_dimension_numbers<[1], [0], [0], [1], [0, 0, 1, 1], [], []>} : vector<8x8xf32>, vector<8x256xf32>, vector<8x256xf32> -> vector<8x256xf32>
    %23 = arith.addf %14, %22 : vector<8x256xf32>
    %c15_i32 = arith.constant 15 : i32
    %24 = tpu.dynamic_rotate %1 by %c15_i32 dim 1 : vector<8x256xf32>, i32 -> vector<8x256xf32>
    %25 = vector.extract_strided_slice %2 {offsets = [2, 0, 0], sizes = [1, 1, 256], strides = [1, 1, 1]} : vector<9x1x256xf32> to vector<1x1x256xf32>
    %26 = vector.shape_cast %25 : vector<1x1x256xf32> to vector<1x256xf32>
    %27 = vector.broadcast %26 : vector<1x256xf32> to vector<8x256xf32>
    %28 = arith.mulf %24, %27 : vector<8x256xf32>
    %29 = vector.extract_strided_slice %3 {offsets = [2, 0, 0], sizes = [1, 8, 8], strides = [1, 1, 1]} : vector<9x8x8xf32> to vector<1x8x8xf32>
    %30 = vector.shape_cast %29 : vector<1x8x8xf32> to vector<8x8xf32>
    %cst_12 = arith.constant dense<0.000000e+00> : vector<8x256xf32>
    %31 = tpu.matmul %30, %28, %cst_12 {dimension_numbers = #tpu.dot_dimension_numbers<[1], [0], [0], [1], [0, 0, 1, 1], [], []>} : vector<8x8xf32>, vector<8x256xf32>, vector<8x256xf32> -> vector<8x256xf32>
    %32 = arith.addf %23, %31 : vector<8x256xf32>
    %c1_i32 = arith.constant 1 : i32
    %33 = tpu.dynamic_rotate %1 by %c1_i32 dim 1 : vector<8x256xf32>, i32 -> vector<8x256xf32>
    %34 = vector.extract_strided_slice %2 {offsets = [3, 0, 0], sizes = [1, 1, 256], strides = [1, 1, 1]} : vector<9x1x256xf32> to vector<1x1x256xf32>
    %35 = vector.shape_cast %34 : vector<1x1x256xf32> to vector<1x256xf32>
    %36 = vector.broadcast %35 : vector<1x256xf32> to vector<8x256xf32>
    %37 = arith.mulf %33, %36 : vector<8x256xf32>
    %38 = vector.extract_strided_slice %3 {offsets = [3, 0, 0], sizes = [1, 8, 8], strides = [1, 1, 1]} : vector<9x8x8xf32> to vector<1x8x8xf32>
    %39 = vector.shape_cast %38 : vector<1x8x8xf32> to vector<8x8xf32>
    %cst_13 = arith.constant dense<0.000000e+00> : vector<8x256xf32>
    %40 = tpu.matmul %39, %37, %cst_13 {dimension_numbers = #tpu.dot_dimension_numbers<[1], [0], [0], [1], [0, 0, 1, 1], [], []>} : vector<8x8xf32>, vector<8x256xf32>, vector<8x256xf32> -> vector<8x256xf32>
    %41 = arith.addf %32, %40 : vector<8x256xf32>
    %42 = vector.extract_strided_slice %3 {offsets = [4, 0, 0], sizes = [1, 8, 8], strides = [1, 1, 1]} : vector<9x8x8xf32> to vector<1x8x8xf32>
    %43 = vector.shape_cast %42 : vector<1x8x8xf32> to vector<8x8xf32>
    %cst_14 = arith.constant dense<0.000000e+00> : vector<8x256xf32>
    %44 = tpu.matmul %43, %1, %cst_14 {dimension_numbers = #tpu.dot_dimension_numbers<[1], [0], [0], [1], [0, 0, 1, 1], [], []>} : vector<8x8xf32>, vector<8x256xf32>, vector<8x256xf32> -> vector<8x256xf32>
    %45 = arith.addf %41, %44 : vector<8x256xf32>
    %c255_i32 = arith.constant 255 : i32
    %46 = tpu.dynamic_rotate %1 by %c255_i32 dim 1 : vector<8x256xf32>, i32 -> vector<8x256xf32>
    %47 = vector.extract_strided_slice %2 {offsets = [5, 0, 0], sizes = [1, 1, 256], strides = [1, 1, 1]} : vector<9x1x256xf32> to vector<1x1x256xf32>
    %48 = vector.shape_cast %47 : vector<1x1x256xf32> to vector<1x256xf32>
    %49 = vector.broadcast %48 : vector<1x256xf32> to vector<8x256xf32>
    %50 = arith.mulf %46, %49 : vector<8x256xf32>
    %51 = vector.extract_strided_slice %3 {offsets = [5, 0, 0], sizes = [1, 8, 8], strides = [1, 1, 1]} : vector<9x8x8xf32> to vector<1x8x8xf32>
    %52 = vector.shape_cast %51 : vector<1x8x8xf32> to vector<8x8xf32>
    %cst_15 = arith.constant dense<0.000000e+00> : vector<8x256xf32>
    %53 = tpu.matmul %52, %50, %cst_15 {dimension_numbers = #tpu.dot_dimension_numbers<[1], [0], [0], [1], [0, 0, 1, 1], [], []>} : vector<8x8xf32>, vector<8x256xf32>, vector<8x256xf32> -> vector<8x256xf32>
    %54 = arith.addf %45, %53 : vector<8x256xf32>
    %c241_i32 = arith.constant 241 : i32
    %55 = tpu.dynamic_rotate %1 by %c241_i32 dim 1 : vector<8x256xf32>, i32 -> vector<8x256xf32>
    %56 = vector.extract_strided_slice %2 {offsets = [6, 0, 0], sizes = [1, 1, 256], strides = [1, 1, 1]} : vector<9x1x256xf32> to vector<1x1x256xf32>
    %57 = vector.shape_cast %56 : vector<1x1x256xf32> to vector<1x256xf32>
    %58 = vector.broadcast %57 : vector<1x256xf32> to vector<8x256xf32>
    %59 = arith.mulf %55, %58 : vector<8x256xf32>
    %60 = vector.extract_strided_slice %3 {offsets = [6, 0, 0], sizes = [1, 8, 8], strides = [1, 1, 1]} : vector<9x8x8xf32> to vector<1x8x8xf32>
    %61 = vector.shape_cast %60 : vector<1x8x8xf32> to vector<8x8xf32>
    %cst_16 = arith.constant dense<0.000000e+00> : vector<8x256xf32>
    %62 = tpu.matmul %61, %59, %cst_16 {dimension_numbers = #tpu.dot_dimension_numbers<[1], [0], [0], [1], [0, 0, 1, 1], [], []>} : vector<8x8xf32>, vector<8x256xf32>, vector<8x256xf32> -> vector<8x256xf32>
    %63 = arith.addf %54, %62 : vector<8x256xf32>
    %c240_i32 = arith.constant 240 : i32
    %64 = tpu.dynamic_rotate %1 by %c240_i32 dim 1 : vector<8x256xf32>, i32 -> vector<8x256xf32>
    %65 = vector.extract_strided_slice %2 {offsets = [7, 0, 0], sizes = [1, 1, 256], strides = [1, 1, 1]} : vector<9x1x256xf32> to vector<1x1x256xf32>
    %66 = vector.shape_cast %65 : vector<1x1x256xf32> to vector<1x256xf32>
    %67 = vector.broadcast %66 : vector<1x256xf32> to vector<8x256xf32>
    %68 = arith.mulf %64, %67 : vector<8x256xf32>
    %69 = vector.extract_strided_slice %3 {offsets = [7, 0, 0], sizes = [1, 8, 8], strides = [1, 1, 1]} : vector<9x8x8xf32> to vector<1x8x8xf32>
    %70 = vector.shape_cast %69 : vector<1x8x8xf32> to vector<8x8xf32>
    %cst_17 = arith.constant dense<0.000000e+00> : vector<8x256xf32>
    %71 = tpu.matmul %70, %68, %cst_17 {dimension_numbers = #tpu.dot_dimension_numbers<[1], [0], [0], [1], [0, 0, 1, 1], [], []>} : vector<8x8xf32>, vector<8x256xf32>, vector<8x256xf32> -> vector<8x256xf32>
    %72 = arith.addf %63, %71 : vector<8x256xf32>
    %c239_i32 = arith.constant 239 : i32
    %73 = tpu.dynamic_rotate %1 by %c239_i32 dim 1 : vector<8x256xf32>, i32 -> vector<8x256xf32>
    %74 = vector.extract_strided_slice %2 {offsets = [8, 0, 0], sizes = [1, 1, 256], strides = [1, 1, 1]} : vector<9x1x256xf32> to vector<1x1x256xf32>
    %75 = vector.shape_cast %74 : vector<1x1x256xf32> to vector<1x256xf32>
    %76 = vector.broadcast %75 : vector<1x256xf32> to vector<8x256xf32>
    %77 = arith.mulf %73, %76 : vector<8x256xf32>
    %78 = vector.extract_strided_slice %3 {offsets = [8, 0, 0], sizes = [1, 8, 8], strides = [1, 1, 1]} : vector<9x8x8xf32> to vector<1x8x8xf32>
    %79 = vector.shape_cast %78 : vector<1x8x8xf32> to vector<8x8xf32>
    %cst_18 = arith.constant dense<0.000000e+00> : vector<8x256xf32>
    %80 = tpu.matmul %79, %77, %cst_18 {dimension_numbers = #tpu.dot_dimension_numbers<[1], [0], [0], [1], [0, 0, 1, 1], [], []>} : vector<8x8xf32>, vector<8x256xf32>, vector<8x256xf32> -> vector<8x256xf32>
    %81 = arith.addf %72, %80 : vector<8x256xf32>
    %82 = vector.broadcast %4 : vector<8x1xf32> to vector<8x256xf32>
    %83 = arith.addf %81, %82 : vector<8x256xf32>
    %cst_19 = arith.constant 0.000000e+00 : f32
    %84 = vector.broadcast %cst_19 : f32 to vector<8x256xf32>
    %85 = arith.cmpf oge, %83, %84 : vector<8x256xf32>
    %cst_20 = arith.constant 1.000000e-01 : f32
    %86 = vector.broadcast %cst_20 : f32 to vector<8x256xf32>
    %87 = arith.mulf %86, %83 : vector<8x256xf32>
    %88 = arith.select %85, %83, %87 : vector<8x256xi1>, vector<8x256xf32>
    %c0_21 = arith.constant 0 : index
    %c0_22 = arith.constant 0 : index
    %c0_23 = arith.constant 0 : index
    %89 = vector.load %arg4[%c0_21, %c0_22, %c0_23] : memref<9x8x8xf32, #tpu.memory_space<vmem>>, vector<9x8x8xf32>
    %c0_24 = arith.constant 0 : index
    %c0_25 = arith.constant 0 : index
    %90 = vector.load %arg5[%c0_24, %c0_25] : memref<8x1xf32, #tpu.memory_space<vmem>>, vector<8x1xf32>
    %cst_26 = arith.constant 0.000000e+00 : f32
    %91 = vector.broadcast %cst_26 : f32 to vector<8x256xf32>
    %c17_i32_27 = arith.constant 17 : i32
    %92 = tpu.dynamic_rotate %88 by %c17_i32_27 dim 1 : vector<8x256xf32>, i32 -> vector<8x256xf32>
    %93 = vector.extract_strided_slice %2 {offsets = [0, 0, 0], sizes = [1, 1, 256], strides = [1, 1, 1]} : vector<9x1x256xf32> to vector<1x1x256xf32>
    %94 = vector.shape_cast %93 : vector<1x1x256xf32> to vector<1x256xf32>
    %95 = vector.broadcast %94 : vector<1x256xf32> to vector<8x256xf32>
    %96 = arith.mulf %92, %95 : vector<8x256xf32>
    %97 = vector.extract_strided_slice %89 {offsets = [0, 0, 0], sizes = [1, 8, 8], strides = [1, 1, 1]} : vector<9x8x8xf32> to vector<1x8x8xf32>
    %98 = vector.shape_cast %97 : vector<1x8x8xf32> to vector<8x8xf32>
    %cst_28 = arith.constant dense<0.000000e+00> : vector<8x256xf32>
    %99 = tpu.matmul %98, %96, %cst_28 {dimension_numbers = #tpu.dot_dimension_numbers<[1], [0], [0], [1], [0, 0, 1, 1], [], []>} : vector<8x8xf32>, vector<8x256xf32>, vector<8x256xf32> -> vector<8x256xf32>
    %100 = arith.addf %91, %99 : vector<8x256xf32>
    %c16_i32_29 = arith.constant 16 : i32
    %101 = tpu.dynamic_rotate %88 by %c16_i32_29 dim 1 : vector<8x256xf32>, i32 -> vector<8x256xf32>
    %102 = vector.extract_strided_slice %2 {offsets = [1, 0, 0], sizes = [1, 1, 256], strides = [1, 1, 1]} : vector<9x1x256xf32> to vector<1x1x256xf32>
    %103 = vector.shape_cast %102 : vector<1x1x256xf32> to vector<1x256xf32>
    %104 = vector.broadcast %103 : vector<1x256xf32> to vector<8x256xf32>
    %105 = arith.mulf %101, %104 : vector<8x256xf32>
    %106 = vector.extract_strided_slice %89 {offsets = [1, 0, 0], sizes = [1, 8, 8], strides = [1, 1, 1]} : vector<9x8x8xf32> to vector<1x8x8xf32>
    %107 = vector.shape_cast %106 : vector<1x8x8xf32> to vector<8x8xf32>
    %cst_30 = arith.constant dense<0.000000e+00> : vector<8x256xf32>
    %108 = tpu.matmul %107, %105, %cst_30 {dimension_numbers = #tpu.dot_dimension_numbers<[1], [0], [0], [1], [0, 0, 1, 1], [], []>} : vector<8x8xf32>, vector<8x256xf32>, vector<8x256xf32> -> vector<8x256xf32>
    %109 = arith.addf %100, %108 : vector<8x256xf32>
    %c15_i32_31 = arith.constant 15 : i32
    %110 = tpu.dynamic_rotate %88 by %c15_i32_31 dim 1 : vector<8x256xf32>, i32 -> vector<8x256xf32>
    %111 = vector.extract_strided_slice %2 {offsets = [2, 0, 0], sizes = [1, 1, 256], strides = [1, 1, 1]} : vector<9x1x256xf32> to vector<1x1x256xf32>
    %112 = vector.shape_cast %111 : vector<1x1x256xf32> to vector<1x256xf32>
    %113 = vector.broadcast %112 : vector<1x256xf32> to vector<8x256xf32>
    %114 = arith.mulf %110, %113 : vector<8x256xf32>
    %115 = vector.extract_strided_slice %89 {offsets = [2, 0, 0], sizes = [1, 8, 8], strides = [1, 1, 1]} : vector<9x8x8xf32> to vector<1x8x8xf32>
    %116 = vector.shape_cast %115 : vector<1x8x8xf32> to vector<8x8xf32>
    %cst_32 = arith.constant dense<0.000000e+00> : vector<8x256xf32>
    %117 = tpu.matmul %116, %114, %cst_32 {dimension_numbers = #tpu.dot_dimension_numbers<[1], [0], [0], [1], [0, 0, 1, 1], [], []>} : vector<8x8xf32>, vector<8x256xf32>, vector<8x256xf32> -> vector<8x256xf32>
    %118 = arith.addf %109, %117 : vector<8x256xf32>
    %c1_i32_33 = arith.constant 1 : i32
    %119 = tpu.dynamic_rotate %88 by %c1_i32_33 dim 1 : vector<8x256xf32>, i32 -> vector<8x256xf32>
    %120 = vector.extract_strided_slice %2 {offsets = [3, 0, 0], sizes = [1, 1, 256], strides = [1, 1, 1]} : vector<9x1x256xf32> to vector<1x1x256xf32>
    %121 = vector.shape_cast %120 : vector<1x1x256xf32> to vector<1x256xf32>
    %122 = vector.broadcast %121 : vector<1x256xf32> to vector<8x256xf32>
    %123 = arith.mulf %119, %122 : vector<8x256xf32>
    %124 = vector.extract_strided_slice %89 {offsets = [3, 0, 0], sizes = [1, 8, 8], strides = [1, 1, 1]} : vector<9x8x8xf32> to vector<1x8x8xf32>
    %125 = vector.shape_cast %124 : vector<1x8x8xf32> to vector<8x8xf32>
    %cst_34 = arith.constant dense<0.000000e+00> : vector<8x256xf32>
    %126 = tpu.matmul %125, %123, %cst_34 {dimension_numbers = #tpu.dot_dimension_numbers<[1], [0], [0], [1], [0, 0, 1, 1], [], []>} : vector<8x8xf32>, vector<8x256xf32>, vector<8x256xf32> -> vector<8x256xf32>
    %127 = arith.addf %118, %126 : vector<8x256xf32>
    %128 = vector.extract_strided_slice %89 {offsets = [4, 0, 0], sizes = [1, 8, 8], strides = [1, 1, 1]} : vector<9x8x8xf32> to vector<1x8x8xf32>
    %129 = vector.shape_cast %128 : vector<1x8x8xf32> to vector<8x8xf32>
    %cst_35 = arith.constant dense<0.000000e+00> : vector<8x256xf32>
    %130 = tpu.matmul %129, %88, %cst_35 {dimension_numbers = #tpu.dot_dimension_numbers<[1], [0], [0], [1], [0, 0, 1, 1], [], []>} : vector<8x8xf32>, vector<8x256xf32>, vector<8x256xf32> -> vector<8x256xf32>
    %131 = arith.addf %127, %130 : vector<8x256xf32>
    %c255_i32_36 = arith.constant 255 : i32
    %132 = tpu.dynamic_rotate %88 by %c255_i32_36 dim 1 : vector<8x256xf32>, i32 -> vector<8x256xf32>
    %133 = vector.extract_strided_slice %2 {offsets = [5, 0, 0], sizes = [1, 1, 256], strides = [1, 1, 1]} : vector<9x1x256xf32> to vector<1x1x256xf32>
    %134 = vector.shape_cast %133 : vector<1x1x256xf32> to vector<1x256xf32>
    %135 = vector.broadcast %134 : vector<1x256xf32> to vector<8x256xf32>
    %136 = arith.mulf %132, %135 : vector<8x256xf32>
    %137 = vector.extract_strided_slice %89 {offsets = [5, 0, 0], sizes = [1, 8, 8], strides = [1, 1, 1]} : vector<9x8x8xf32> to vector<1x8x8xf32>
    %138 = vector.shape_cast %137 : vector<1x8x8xf32> to vector<8x8xf32>
    %cst_37 = arith.constant dense<0.000000e+00> : vector<8x256xf32>
    %139 = tpu.matmul %138, %136, %cst_37 {dimension_numbers = #tpu.dot_dimension_numbers<[1], [0], [0], [1], [0, 0, 1, 1], [], []>} : vector<8x8xf32>, vector<8x256xf32>, vector<8x256xf32> -> vector<8x256xf32>
    %140 = arith.addf %131, %139 : vector<8x256xf32>
    %c241_i32_38 = arith.constant 241 : i32
    %141 = tpu.dynamic_rotate %88 by %c241_i32_38 dim 1 : vector<8x256xf32>, i32 -> vector<8x256xf32>
    %142 = vector.extract_strided_slice %2 {offsets = [6, 0, 0], sizes = [1, 1, 256], strides = [1, 1, 1]} : vector<9x1x256xf32> to vector<1x1x256xf32>
    %143 = vector.shape_cast %142 : vector<1x1x256xf32> to vector<1x256xf32>
    %144 = vector.broadcast %143 : vector<1x256xf32> to vector<8x256xf32>
    %145 = arith.mulf %141, %144 : vector<8x256xf32>
    %146 = vector.extract_strided_slice %89 {offsets = [6, 0, 0], sizes = [1, 8, 8], strides = [1, 1, 1]} : vector<9x8x8xf32> to vector<1x8x8xf32>
    %147 = vector.shape_cast %146 : vector<1x8x8xf32> to vector<8x8xf32>
    %cst_39 = arith.constant dense<0.000000e+00> : vector<8x256xf32>
    %148 = tpu.matmul %147, %145, %cst_39 {dimension_numbers = #tpu.dot_dimension_numbers<[1], [0], [0], [1], [0, 0, 1, 1], [], []>} : vector<8x8xf32>, vector<8x256xf32>, vector<8x256xf32> -> vector<8x256xf32>
    %149 = arith.addf %140, %148 : vector<8x256xf32>
    %c240_i32_40 = arith.constant 240 : i32
    %150 = tpu.dynamic_rotate %88 by %c240_i32_40 dim 1 : vector<8x256xf32>, i32 -> vector<8x256xf32>
    %151 = vector.extract_strided_slice %2 {offsets = [7, 0, 0], sizes = [1, 1, 256], strides = [1, 1, 1]} : vector<9x1x256xf32> to vector<1x1x256xf32>
    %152 = vector.shape_cast %151 : vector<1x1x256xf32> to vector<1x256xf32>
    %153 = vector.broadcast %152 : vector<1x256xf32> to vector<8x256xf32>
    %154 = arith.mulf %150, %153 : vector<8x256xf32>
    %155 = vector.extract_strided_slice %89 {offsets = [7, 0, 0], sizes = [1, 8, 8], strides = [1, 1, 1]} : vector<9x8x8xf32> to vector<1x8x8xf32>
    %156 = vector.shape_cast %155 : vector<1x8x8xf32> to vector<8x8xf32>
    %cst_41 = arith.constant dense<0.000000e+00> : vector<8x256xf32>
    %157 = tpu.matmul %156, %154, %cst_41 {dimension_numbers = #tpu.dot_dimension_numbers<[1], [0], [0], [1], [0, 0, 1, 1], [], []>} : vector<8x8xf32>, vector<8x256xf32>, vector<8x256xf32> -> vector<8x256xf32>
    %158 = arith.addf %149, %157 : vector<8x256xf32>
    %c239_i32_42 = arith.constant 239 : i32
    %159 = tpu.dynamic_rotate %88 by %c239_i32_42 dim 1 : vector<8x256xf32>, i32 -> vector<8x256xf32>
    %160 = vector.extract_strided_slice %2 {offsets = [8, 0, 0], sizes = [1, 1, 256], strides = [1, 1, 1]} : vector<9x1x256xf32> to vector<1x1x256xf32>
    %161 = vector.shape_cast %160 : vector<1x1x256xf32> to vector<1x256xf32>
    %162 = vector.broadcast %161 : vector<1x256xf32> to vector<8x256xf32>
    %163 = arith.mulf %159, %162 : vector<8x256xf32>
    %164 = vector.extract_strided_slice %89 {offsets = [8, 0, 0], sizes = [1, 8, 8], strides = [1, 1, 1]} : vector<9x8x8xf32> to vector<1x8x8xf32>
    %165 = vector.shape_cast %164 : vector<1x8x8xf32> to vector<8x8xf32>
    %cst_43 = arith.constant dense<0.000000e+00> : vector<8x256xf32>
    %166 = tpu.matmul %165, %163, %cst_43 {dimension_numbers = #tpu.dot_dimension_numbers<[1], [0], [0], [1], [0, 0, 1, 1], [], []>} : vector<8x8xf32>, vector<8x256xf32>, vector<8x256xf32> -> vector<8x256xf32>
    %167 = arith.addf %158, %166 : vector<8x256xf32>
    %168 = vector.broadcast %90 : vector<8x1xf32> to vector<8x256xf32>
    %169 = arith.addf %167, %168 : vector<8x256xf32>
    %cst_44 = arith.constant 0.000000e+00 : f32
    %170 = vector.broadcast %cst_44 : f32 to vector<8x256xf32>
    %171 = arith.cmpf oge, %169, %170 : vector<8x256xf32>
    %cst_45 = arith.constant 1.000000e-01 : f32
    %172 = vector.broadcast %cst_45 : f32 to vector<8x256xf32>
    %173 = arith.mulf %172, %169 : vector<8x256xf32>
    %174 = arith.select %171, %169, %173 : vector<8x256xi1>, vector<8x256xf32>
    %c0_46 = arith.constant 0 : index
    %c0_47 = arith.constant 0 : index
    %c0_48 = arith.constant 0 : index
    %175 = vector.load %arg7[%c0_46, %c0_47, %c0_48] : memref<1x8x256xf32, #tpu.memory_space<vmem>>, vector<1x8x256xf32>
    %176 = vector.shape_cast %175 : vector<1x8x256xf32> to vector<8x256xf32>
    %177 = vector.shape_cast %174 : vector<8x256xf32> to vector<1x8x256xf32>
    tpu.vector_store %arg7[%c0_46, %c0_47, %c0_48], %177 {strides = array<i32>} : memref<1x8x256xf32, #tpu.memory_space<vmem>>, vector<1x8x256xf32>,
    return
  }
  func.func @transform_0(%arg0: i32) -> (i32, i32, i32) {
    %c0_i32 = arith.constant 0 : i32
    %c0_i32_0 = arith.constant 0 : i32
    %c0_i32_1 = arith.constant 0 : i32
    return %arg0, %c0_i32, %c0_i32_0 : i32, i32, i32
  }
  func.func @transform_1(%arg0: i32) -> (i32, i32, i32) {
    %c0_i32 = arith.constant 0 : i32
    %c0_i32_0 = arith.constant 0 : i32
    %c0_i32_1 = arith.constant 0 : i32
    %c0_i32_2 = arith.constant 0 : i32
    return %c0_i32, %c0_i32_0, %c0_i32_1 : i32, i32, i32
  }
  func.func @transform_2(%arg0: i32) -> (i32, i32) {
    %c0_i32 = arith.constant 0 : i32
    %c0_i32_0 = arith.constant 0 : i32
    %c0_i32_1 = arith.constant 0 : i32
    return %c0_i32, %c0_i32_0 : i32, i32
  }
  func.func @transform_3(%arg0: i32) -> (i32, i32, i32) {
    %c0_i32 = arith.constant 0 : i32
    %c0_i32_0 = arith.constant 0 : i32
    %c0_i32_1 = arith.constant 0 : i32
    %c0_i32_2 = arith.constant 0 : i32
    return %c0_i32, %c0_i32_0, %c0_i32_1 : i32, i32, i32
  }
  func.func @transform_4(%arg0: i32) -> (i32, i32) {
    %c0_i32 = arith.constant 0 : i32
    %c0_i32_0 = arith.constant 0 : i32
    %c0_i32_1 = arith.constant 0 : i32
    return %c0_i32, %c0_i32_0 : i32, i32
  }
  func.func @transform_5(%arg0: i32) -> (i32, i32, i32) {
    %c0_i32 = arith.constant 0 : i32
    %c0_i32_0 = arith.constant 0 : i32
    %c0_i32_1 = arith.constant 0 : i32
    %c0_i32_2 = arith.constant 0 : i32
    return %c0_i32, %c0_i32_0, %c0_i32_1 : i32, i32, i32
  }
  func.func @transform_6(%arg0: i32) -> (i32, i32, i32) {
    %c0_i32 = arith.constant 0 : i32
    %c0_i32_0 = arith.constant 0 : i32
    %c0_i32_1 = arith.constant 0 : i32
    return %arg0, %c0_i32, %c0_i32_0 : i32, i32, i32
  }
}

</mosaic_0001>

<bundles_post_ra>
// kernel: downblock_forward.1
= control target key start
LH: loop header
LB: loop body
LE: loop exit
PB: predicated region body
PF: predicated region fallthrough
CT: control target
= control target key end

     0   :  { %s2087_s21 = smov 0   ;;  %s2454_s0 = inlined_call_operand.vmem [shape: f32[2,8,256], index: 0, kind: input, shape index: {}]   ;;  %s2455_s1 = inlined_call_operand.vmem [shape: f32[9,8,8], index: 1, kind: input, shape index: {}]   ;;  %s2456_s2 = inlined_call_operand.vmem [shape: f32[8,1], index: 2, kind: input, shape index: {}]   ;;  %s2457_s3 = inlined_call_operand.vmem [shape: f32[9,8,8], index: 3, kind: input, shape index: {}]   ;;  %s2458_s4 = inlined_call_operand.vmem [shape: f32[8,1], index: 4, kind: input, shape index: {}]   ;;  %s2459_s5 = inlined_call_operand.vmem [shape: f32[9,1,256], index: 5, kind: input, shape index: {}]   ;;  %s2460_s6 = inlined_call_operand.vmem [shape: f32[2,8,256], index: 6, kind: output, shape index: {}]  }
   0x1 LB: > { %s1952_s22 = sadd.s32 4294967295, %s2040_s21   ;;  %p1956_p0 = scmp.ge.s32.totalorder %s2040_s21, 1  ;;  %s2040_s21 = sphi %s2087_s21, %s16_s21  }
   0x2   : > { %p212_p1 = scmp.lt.s32.totalorder %s2040_s21, 3 }
   0x4   : > { %p213_p2 = pnand %p1956_p0, %p212_p1 }
   0x5   : > { %p242_p3 = scmp.lt.s32.totalorder (!%p213_p2), %s1952_s22, 1  ;;  %v2042_v0 = vmov (!%p213_p2), 0.0   ;;  %s2043_s27 = smov (!%p213_p2), 17   ;;  %v271_v3 = vld [vmem:[%s2456_s2] sm:$0xff] (!%p213_p2)  ;;  %v2051_v4 = vmov (!%p213_p2), 0   ;;  %v276_v5 = vlaneseq (!%p213_p2)  ;;  %v263_v30 = vld [vmem:[%s2455_s1 + $0x8] sm:$0xff] (!%p213_p2) }
   0x6   : > { %216 = sbr.rel (%p213_p2) target bundleno = 829 (0x33d), region = 44  ;;  %382 = vmatprep.mubr.f32.mxu0 (!%p213_p2), %v2042_v0  ;;  %1221 = vmatprep.mubr.f32.mxu1 (!%p213_p2), %v2042_v0  ;;  %s2044_s28 = smov (!%p213_p2), 16   ;;  %v254_v10 = vld [vmem:[%s2459_s5] sm:$0x3] (!%p213_p2)  ;;  %v255_v11 = vld [vmem:[%s2459_s5 + $0x2] sm:$0x3] (!%p213_p2) }
   0x7   : > { %s2045_s29 = smov (!%p213_p2), 15   ;;  %s2046_s30 = smov (!%p213_p2), 1   ;;  %2033 = vset.pattern.permute.xlu0 (!%p213_p2), %v2051_v4  ;;  %v283_v6 = vshrl.u32 (!%p213_p2), %v276_v5, 7  ;;  %v2144_v7 = vand.u32 (!%p213_p2), 127, %v276_v5  ;;  %v256_v18 = vld [vmem:[%s2459_s5 + $0x4] sm:$0x3] (!%p213_p2) }
   0x8   : > { %s2047_s7 = smov (!%p213_p2), 127   ;;  %s2048_s8 = smov (!%p213_p2), 113   ;;  %vm314_vm3 = vcmask (!%p213_p2), 64512   ;;  %v257_v34 = vld [vmem:[%s2459_s5 + $0x6] sm:$0x3] (!%p213_p2)  ;;  %v264_v48 = vld [vmem:[%s2455_s1 + $0x10] sm:$0xff] (!%p213_p2) }
   0x9   : > { %s2049_s9 = smov (!%p213_p2), 112   ;;  %s2050_s10 = smov (!%p213_p2), 111   ;;  %v2146_v8 = vsub.s32 (!%p213_p2), 0, %v283_v6  ;;  %v2148_v9 = vsub.s32 (!%p213_p2), 1, %v283_v6  ;;  %vm278_vm0 = vcmp.lt.s32.totalorder (!%p213_p2), %v2144_v7, 17  ;;  %vm298_vm1 = vcmp.lt.s32.totalorder (!%p213_p2), %v2144_v7, 16 }
   0xa   : > { %vm467_vm2 = vcmp.lt.s32.totalorder (!%p213_p2), %v2144_v7, 15  ;;  %vm563_vm4 = vcmp.lt.s32.totalorder (!%p213_p2), %v2144_v7, 1  ;;  %v262_v43 = vld [vmem:[%s2455_s1] sm:$0xff] (!%p213_p2)  ;;  %v258_v49 = vld [vmem:[%s2459_s5 + $0xa] sm:$0x3] (!%p213_p2)  ;;  %vm735_vm5 = vcmp.lt.s32.totalorder (!%p213_p2), %v2144_v7, 127 }
   0xb   : > { %v2158_v14 = vrot.slane (!%p213_p2), %v254_v10, %v2148_v9  ;;  %v2162_v15 = vrot.slane (!%p213_p2), %v255_v11, %v2148_v9  ;;  %v2165_v16 = vrot.slane (!%p213_p2), %v255_v11, %v2146_v8  ;;  %v2168_v17 = vrot.slane (!%p213_p2), %v254_v10, %v2146_v8  ;;  %v265_v54 = vld [vmem:[%s2455_s1 + $0x18] sm:$0xff] (!%p213_p2)  ;;  %v259_v56 = vld [vmem:[%s2459_s5 + $0xc] sm:$0x3] (!%p213_p2) }
   0xc   : > { %v2186_v28 = vrot.slane (!%p213_p2), %v256_v18, %v2148_v9  ;;  %v2201_v36 = vrot.slane (!%p213_p2), %v256_v18, %v2146_v8  ;;  %v2207_v39 = vrot.slane (!%p213_p2), %v257_v34, %v2148_v9  ;;  %v2218_v45 = vrot.slane (!%p213_p2), %v257_v34, %v2146_v8  ;;  %v267_v18 = vld [vmem:[%s2455_s1 + $0x28] sm:$0xff] (!%p213_p2) }
   0xd   : > { %s2462_s22 = smov (!%p242_p3, %s1952_s22), 1  ;;  %v2235_v52 = vrot.slane %v258_v49, %v2148_v9  ;;  %vm831_vm6 = vcmp.lt.s32.totalorder %v2144_v7, 113  ;;  %v2250_v59 = vrot.slane %v258_v49, %v2146_v8  ;;  %v2256_v61 = vrot.slane %v259_v56, %v2148_v9 }
   0xe   : > { %s1981_s23 = sshll.u32 %s2462_s22, 4  ;;  %vm927_vm7 = vcmp.lt.s32.totalorder %v2144_v7, 112  ;;  %v2271_v6 = vrot.slane %v259_v56, %v2146_v8  ;;  %vm1023_vm8 = vcmp.lt.s32.totalorder %v2144_v7, 111 }
   0xf   : > { %s246_s26 = scalar_lea.vmem %s2454_s0, %s1981_s23 }
  0x10   : > { %v2105_v1 = vld [vmem:[%s246_s26] sm:$0xff]  ;;  %v2111_v2 = vld [vmem:[%s246_s26 + $0x8] sm:$0xff] }
  0x11   : > { %272 = vrot.lane.b32.xlu1 %v2105_v1, %s2043_s27  ;;  %294 = vrot.lane.b32.xlu0 %v2105_v1, %s2044_s28 }
  0x15   : > { %274 = vrot.lane.b32.xlu1 %v2111_v2, %s2043_s27  ;;  %296 = vrot.lane.b32.xlu0 %v2111_v2, %s2044_s28 }
  0x19   : > { %465 = vrot.lane.b32.xlu1 %v2111_v2, %s2045_s29  ;;  %463 = vrot.lane.b32.xlu0 %v2105_v1, %s2045_s29 }
  0x1d   : > { %561 = vrot.lane.b32.xlu1 %v2111_v2, %s2046_s30  ;;  %559 = vrot.lane.b32.xlu0 %v2105_v1, %s2046_s30 }
  0x21   : > { %733 = vrot.lane.b32.xlu1 %v2111_v2, %s2047_s7  ;;  %731 = vrot.lane.b32.xlu0 %v2105_v1, %s2047_s7 }
  0x25   : > { %829 = vrot.lane.b32.xlu1 %v2111_v2, %s2048_s8  ;;  %827 = vrot.lane.b32.xlu0 %v2105_v1, %s2048_s8 }
  0x29   : > { %925 = vrot.lane.b32.xlu1 %v2111_v2, %s2049_s9  ;;  %923 = vrot.lane.b32.xlu0 %v2105_v1, %s2049_s9 }
  0x2d   : > { %1021 = vrot.lane.b32.xlu1 %v2111_v2, %s2050_s10  ;;  %1019 = vrot.lane.b32.xlu0 %v2105_v1, %s2050_s10 }
  0x31   : > { %1117 = vperm.xlu0 %2033, %v271_v3   ;;  %v260_v3 = vld [vmem:[%s2459_s5 + $0xe] sm:$0x3] }
  0x32   : > { %v2277_v11 = vrot.slane %v260_v3, %v2148_v9 }
  0x83   : > { %v273_v12 = vpop.permute.xlu1 %272  ;;  %v295_v13 = vpop.permute.xlu0 %294 }
  0x87   : > { %v275_v19 = vpop.permute.xlu1 %274  ;;  %v297_v20 = vpop.permute.xlu0 %296 }
  0x88   : > { %v279_v21 = vsel %vm278_vm0, %v273_v12, %v275_v19  ;;  %v280_v22 = vsel %vm278_vm0, %v275_v19, %v273_v12  ;;  %v300_v23 = vsel %vm298_vm1, %v297_v20, %v295_v13  ;;  %v299_v24 = vsel %vm298_vm1, %v295_v13, %v297_v20  ;;  %v261_v20 = vld [vmem:[%s2459_s5 + $0x10] sm:$0x3] }
  0x89   : > { %v293_v25 = vmul.f32 %v2158_v14, %v279_v21  ;;  %v313_v26 = vmul.f32 %v2162_v15, %v299_v24  ;;  %v312_v27 = vmul.f32 %v2165_v16, %v300_v23  ;;  %v292_v29 = vmul.f32 %v2168_v17, %v280_v22 }
  0x8a   : > { %v2292_v23 = vrot.slane %v260_v3, %v2146_v8 }
  0x8b   : > { %318 = vmatprep.subr.mxu0 %v313_v26  ;;  %v466_v31 = vpop.permute.xlu1 %465  ;;  %v464_v32 = vpop.permute.xlu0 %463 }
  0x8c   : > { %319 = vmatpush1.msra.mxu0 %v312_v27  ;;  %v468_v33 = vsel %vm467_vm2, %v464_v32, %v466_v31  ;;  %v469_v37 = vsel %vm467_vm2, %v466_v31, %v464_v32  ;;  %v2309_v31 = vrot.slane %v261_v20, %v2146_v8  ;;  %v270_v8 = vld [vmem:[%s2455_s1 + $0x40] sm:$0xff] }
  0x8d   : > { %1961 = vmatmul.mubr.msk.f32.vlgmr.msra.gmra.mrb[0].mxu0 %vm314_vm3, %v263_v30  ;;  %392 = vmatprep.subr.mxu0 %v293_v25  ;;  %v482_v35 = vmul.f32 %v2186_v28, %v468_v33  ;;  %v481_v42 = vmul.f32 %v2201_v36, %v469_v37  ;;  %v2298_v25 = vrot.slane %v261_v20, %v2148_v9  ;;  %v269_v33 = vld [vmem:[%s2455_s1 + $0x38] sm:$0xff] }
  0x8e   : > { %393 = vmatpush1.msra.mxu0 %v292_v29  ;;  %456 = vmatprep.mubr.f32.mxu0 %v2042_v0  ;;  %v268_v29 = vld [vmem:[%s2455_s1 + $0x30] sm:$0xff] }
  0x8f   : > { %486 = vmatprep.subr.mxu0 %v482_v35  ;;  %v562_v38 = vpop.permute.xlu1 %561  ;;  %v560_v40 = vpop.permute.xlu0 %559 }
  0x90   : > { %v564_v41 = vsel %vm563_vm4, %v560_v40, %v562_v38  ;;  %v565_v46 = vsel %vm563_vm4, %v562_v38, %v560_v40 }
  0x91   : > { %v578_v44 = vmul.f32 %v2207_v39, %v564_v41  ;;  %v577_v47 = vmul.f32 %v2218_v45, %v565_v46  ;;  %v1137_v46 = vld [vmem:[%s2458_s4] sm:$0xff] }
  0x93   : > { %v734_v50 = vpop.permute.xlu1 %733  ;;  %v732_v51 = vpop.permute.xlu0 %731 }
  0x94   : > { %v737_v53 = vsel %vm735_vm5, %v734_v50, %v732_v51  ;;  %v736_v60 = vsel %vm735_vm5, %v732_v51, %v734_v50 }
  0x95   : > { %1962 = vmatmul.mubr.msk.f32.vlgmr.msra.gmra.mrb[0].mxu0 %vm314_vm3, %v262_v43  ;;  %v750_v55 = vmul.f32 %v2235_v52, %v737_v53  ;;  %v749_v63 = vmul.f32 %v2250_v59, %v736_v60 }
  0x96   : > { %487 = vmatpush1.msra.mxu0 %v481_v42  ;;  %550 = vmatprep.mubr.f32.mxu0 %v2042_v0 }
  0x97   : > { %582 = vmatprep.subr.mxu0 %v578_v44  ;;  %v830_v57 = vpop.permute.xlu1 %829  ;;  %v828_v58 = vpop.permute.xlu0 %827 }
  0x98   : > { %v833_v62 = vsel %vm831_vm6, %v830_v57, %v828_v58  ;;  %v832_v10 = vsel %vm831_vm6, %v828_v58, %v830_v57 }
  0x99   : > { %v845_v13 = vmul.f32 %v2271_v6, %v832_v10 }
  0x9b   : > { %v926_v4 = vpop.permute.xlu1 %925  ;;  %v924_v5 = vpop.permute.xlu0 %923 }
  0x9c   : > { %v929_v12 = vsel %vm927_vm7, %v926_v4, %v924_v5  ;;  %v928_v24 = vsel %vm927_vm7, %v924_v5, %v926_v4 }
  0x9d   : > { %1963 = vmatmul.mubr.msk.f32.vlgmr.msra.gmra.mrb[0].mxu0 %vm314_vm3, %v264_v48  ;;  %v942_v19 = vmul.f32 %v2277_v11, %v929_v12  ;;  %v941_v27 = vmul.f32 %v2292_v23, %v928_v24  ;;  %v1130_v12 = vld [vmem:[%s2457_s3 + $0x10] sm:$0xff] }
  0x9e   : > { %583 = vmatpush1.msra.mxu0 %v577_v47  ;;  %646 = vmatprep.mubr.f32.mxu0 %v2042_v0 }
  0x9f   : > { %658 = vmatprep.subr.mxu0 %v2111_v2  ;;  %v846_v2 = vmul.f32 %v2256_v61, %v833_v62  ;;  %v1022_v21 = vpop.permute.xlu1 %1021  ;;  %v1020_v22 = vpop.permute.xlu0 %1019 }
  0xa0   : > { %v1025_v26 = vsel %vm1023_vm8, %v1022_v21, %v1020_v22  ;;  %v1024_v9 = vsel %vm1023_vm8, %v1020_v22, %v1022_v21 }
  0xa1   : > { %v1038_v30 = vmul.f32 %v2298_v25, %v1025_v26  ;;  %v1037_v32 = vmul.f32 %v2309_v31, %v1024_v9  ;;  %v1132_v26 = vld [vmem:[%s2457_s3 + $0x20] sm:$0xff] }
  0xa5   : > { %1964 = vmatmul.mubr.msk.f32.vlgmr.msra.gmra.mrb[0].mxu0 %vm314_vm3, %v265_v54 }
  0xa6   : > { %659 = vmatpush1.msra.mxu0 %v2105_v1  ;;  %722 = vmatprep.mubr.f32.mxu0 %v2042_v0  ;;  %v266_v1 = vld [vmem:[%s2455_s1 + $0x20] sm:$0xff] }
  0xa7   : > { %754 = vmatprep.subr.mxu0 %v750_v55  ;;  %v1129_v55 = vld [vmem:[%s2457_s3 + $0x8] sm:$0xff] }
  0xad   : > { %1965 = vmatmul.mubr.msk.f32.vlgmr.msra.gmra.mrb[0].mxu0 %vm314_vm3, %v266_v1 }
  0xae   : > { %755 = vmatpush1.msra.mxu0 %v749_v63  ;;  %818 = vmatprep.mubr.f32.mxu0 %v2042_v0 }
  0xaf   : > { %850 = vmatprep.subr.mxu0 %v846_v2 }
  0xb0   : > { %v1118_v34 = vpop.permute.xlu0 %1117 }
  0xb5   : > { %1966 = vmatmul.mubr.msk.f32.vlgmr.msra.gmra.mrb[0].mxu0 %vm314_vm3, %v267_v18 }
  0xb6   : > { %851 = vmatpush1.msra.mxu0 %v845_v13  ;;  %914 = vmatprep.mubr.f32.mxu0 %v2042_v0 }
  0xb7   : > { %946 = vmatprep.subr.mxu0 %v942_v19  ;;  %v1131_v19 = vld [vmem:[%s2457_s3 + $0x18] sm:$0xff] }
  0xbd   : > { %1967 = vmatmul.mubr.msk.f32.vlgmr.msra.gmra.mrb[0].mxu0 %vm314_vm3, %v268_v29 }
  0xbe   : > { %947 = vmatpush1.msra.mxu0 %v941_v27  ;;  %1010 = vmatprep.mubr.f32.mxu0 %v2042_v0 }
  0xbf   : > { %1042 = vmatprep.subr.mxu0 %v1038_v30 }
  0xc5   : > { %1968 = vmatmul.mubr.msk.f32.vlgmr.msra.gmra.mrb[0].mxu0 %vm314_vm3, %v269_v33 }
  0xc6   : > { %1043 = vmatpush1.msra.mxu0 %v1037_v32  ;;  %1106 = vmatprep.mubr.f32.mxu0 %v2042_v0 }
  0xcd   : > { %1969 = vmatmul.mubr.msk.f32.vlgmr.msra.gmra.mrb[0].mxu0 %vm314_vm3, %v270_v8 }
 0x1a0   : > { %v1108_v35 = vpop.f32.mrb[0].mxu0 }
 0x1a1   : > { %v1120_v37 = vadd.f32 %v1118_v34, %v1108_v35  ;;  %v1110_v38 = vpop.f32.mrb[1].mxu0 }
 0x1a2   : > { %v1121_v40 = vadd.f32 %v1118_v34, %v1110_v38 }
 0x1a3   : > { %vm1122_vm9 = vcmp.ge.f32.partialorder %v1120_v37, 0.0  ;;  %v1124_v41 = vmul.f32 0.1, %v1120_v37 }
 0x1a4   : > { %v1125_v43 = vmul.f32 0.1, %v1121_v40  ;;  %vm1123_vm10 = vcmp.ge.f32.partialorder %v1121_v40, 0.0 }
 0x1a5   : > { %v2324_v42 = vsel %vm1122_vm9, %v1120_v37, %v1124_v41  ;;  %v1135_v41 = vld [vmem:[%s2457_s3 + $0x38] sm:$0xff] }
 0x1a6   : > { %1138 = vrot.lane.b32.xlu0 %v2324_v42, %s2043_s27  ;;  %1146 = vrot.lane.b32.xlu1 %v2324_v42, %s2044_s28  ;;  %v1127_v44 = vsel %vm1123_vm10, %v1121_v40, %v1125_v43 }
 0x1aa   : > { %1302 = vrot.lane.b32.xlu0 %v2324_v42, %s2045_s29  ;;  %1148 = vrot.lane.b32.xlu1 %v1127_v44, %s2044_s28  ;;  %s251_s28 = scalar_lea.vmem %s2460_s6, %s1981_s23 }
 0x1ae   : > { %1386 = vrot.lane.b32.xlu0 %v2324_v42, %s2046_s30  ;;  %1140 = vrot.lane.b32.xlu1 %v1127_v44, %s2043_s27 }
 0x1b2   : > { %1546 = vrot.lane.b32.xlu0 %v2324_v42, %s2047_s7  ;;  %1304 = vrot.lane.b32.xlu1 %v1127_v44, %s2045_s29 }
 0x1b6   : > { %1630 = vrot.lane.b32.xlu0 %v2324_v42, %s2048_s8  ;;  %1388 = vrot.lane.b32.xlu1 %v1127_v44, %s2046_s30 }
 0x1ba   : > { %1714 = vrot.lane.b32.xlu0 %v2324_v42, %s2049_s9  ;;  %1548 = vrot.lane.b32.xlu1 %v1127_v44, %s2047_s7 }
 0x1be   : > { %1798 = vrot.lane.b32.xlu0 %v2324_v42, %s2050_s10  ;;  %1632 = vrot.lane.b32.xlu1 %v1127_v44, %s2048_s8 }
 0x1c2   : > { %1884 = vperm.xlu0 %2033, %v1137_v46   ;;  %1716 = vrot.lane.b32.xlu1 %v1127_v44, %s2049_s9 }
 0x1c6   : > { %1800 = vrot.lane.b32.xlu1 %v1127_v44, %s2050_s10 }
 0x218   : > { %v1147_v47 = vpop.permute.xlu1 %1146  ;;  %v1139_v48 = vpop.permute.xlu0 %1138 }
 0x21c   : > { %v1149_v49 = vpop.permute.xlu1 %1148  ;;  %v1303_v60 = vpop.permute.xlu0 %1302 }
 0x21d   : > { %v1151_v50 = vsel %vm298_vm1, %v1149_v49, %v1147_v47  ;;  %v1150_v51 = vsel %vm298_vm1, %v1147_v47, %v1149_v49 }
 0x21e   : > { %v1153_v53 = vmul.f32 %v1150_v51, %v2162_v15  ;;  %v1152_v54 = vmul.f32 %v1151_v50, %v2165_v16 }
 0x220   : > { %1157 = vmatprep.subr.mxu1 %v1153_v53  ;;  %v1141_v56 = vpop.permute.xlu1 %1140 }
 0x221   : > { %v1142_v57 = vsel %vm278_vm0, %v1139_v48, %v1141_v56  ;;  %v1143_v58 = vsel %vm278_vm0, %v1141_v56, %v1139_v48  ;;  %1158 = vmatpush1.msra.mxu1 %v1152_v54 }
 0x222   : > { %v1144_v62 = vmul.f32 %v1143_v58, %v2168_v17  ;;  %v1145_v15 = vmul.f32 %v1142_v57, %v2158_v14  ;;  %1970 = vmatmul.mubr.msk.f32.vlgmr.msra.gmra.mrb[0].mxu1 %vm314_vm3, %v1129_v55  ;;  %v1128_v17 = vld [vmem:[%s2457_s3] sm:$0xff]  ;;  %v1387_v14 = vpop.permute.xlu0 %1386 }
 0x223   : > { %1295 = vmatprep.mubr.f32.mxu1 %v2042_v0 }
 0x224   : > { %1231 = vmatprep.subr.mxu1 %v1145_v15  ;;  %v1305_v16 = vpop.permute.xlu1 %1304 }
 0x225   : > { %v1306_v63 = vsel %vm467_vm2, %v1303_v60, %v1305_v16  ;;  %1232 = vmatpush1.msra.mxu1 %v1144_v62  ;;  %v1307_v1 = vsel %vm467_vm2, %v1305_v16, %v1303_v60 }
 0x226   : > { %v1309_v2 = vmul.f32 %v1306_v63, %v2186_v28  ;;  %v1308_v4 = vmul.f32 %v1307_v1, %v2201_v36  ;;  %v1547_v13 = vpop.permute.xlu0 %1546 }
 0x228   : > { %1313 = vmatprep.subr.mxu1 %v1309_v2  ;;  %v1389_v3 = vpop.permute.xlu1 %1388 }
 0x229   : > { %v1390_v5 = vsel %vm563_vm4, %v1387_v14, %v1389_v3  ;;  %v1391_v28 = vsel %vm563_vm4, %v1389_v3, %v1387_v14 }
 0x22a   : > { %v1393_v10 = vmul.f32 %v1390_v5, %v2207_v39  ;;  %1971 = vmatmul.mubr.msk.f32.vlgmr.msra.gmra.mrb[0].mxu1 %vm314_vm3, %v1128_v17  ;;  %v1392_v36 = vmul.f32 %v1391_v28, %v2218_v45  ;;  %v1631_v21 = vpop.permute.xlu0 %1630 }
 0x22b   : > { %1314 = vmatpush1.msra.mxu1 %v1308_v4  ;;  %1377 = vmatprep.mubr.f32.mxu1 %v2042_v0 }
 0x22c   : > { %1397 = vmatprep.subr.mxu1 %v1393_v10  ;;  %v1549_v39 = vpop.permute.xlu1 %1548 }
 0x22d   : > { %v1551_v18 = vsel %vm735_vm5, %v1549_v39, %v1547_v13  ;;  %v1550_v22 = vsel %vm735_vm5, %v1547_v13, %v1549_v39 }
 0x22e   : > { %v1553_v20 = vmul.f32 %v1551_v18, %v2235_v52  ;;  %v1552_v52 = vmul.f32 %v1550_v22, %v2250_v59  ;;  %v1715_v30 = vpop.permute.xlu0 %1714  ;;  %v1133_v59 = vld [vmem:[%s2457_s3 + $0x28] sm:$0xff] }
 0x230   : > { %v1633_v45 = vpop.permute.xlu1 %1632 }
 0x231   : > { %v1635_v24 = vsel %vm831_vm6, %v1633_v45, %v1631_v21  ;;  %v1634_v9 = vsel %vm831_vm6, %v1631_v21, %v1633_v45 }
 0x232   : > { %1972 = vmatmul.mubr.msk.f32.vlgmr.msra.gmra.mrb[0].mxu1 %vm314_vm3, %v1130_v12  ;;  %v1637_v27 = vmul.f32 %v1635_v24, %v2256_v61  ;;  %v1636_v61 = vmul.f32 %v1634_v9, %v2271_v6  ;;  %v1799_v34 = vpop.permute.xlu0 %1798  ;;  %v1134_v6 = vld [vmem:[%s2457_s3 + $0x30] sm:$0xff] }
 0x233   : > { %1398 = vmatpush1.msra.mxu1 %v1392_v36  ;;  %1461 = vmatprep.mubr.f32.mxu1 %v2042_v0 }
 0x234   : > { %1473 = vmatprep.subr.mxu1 %v1127_v44  ;;  %v1717_v29 = vpop.permute.xlu1 %1716 }
 0x235   : > { %v1719_v32 = vsel %vm927_vm7, %v1717_v29, %v1715_v30  ;;  %v1718_v35 = vsel %vm927_vm7, %v1715_v30, %v1717_v29 }
 0x236   : > { %v1721_v33 = vmul.f32 %v1719_v32, %v2277_v11  ;;  %v1720_v11 = vmul.f32 %v1718_v35, %v2292_v23  ;;  %v1136_v23 = vld [vmem:[%s2457_s3 + $0x40] sm:$0xff] }
 0x238   : > { %v1801_v8 = vpop.permute.xlu1 %1800 }
 0x239   : > { %v1803_v37 = vsel %vm1023_vm8, %v1801_v8, %v1799_v34  ;;  %v1802_v40 = vsel %vm1023_vm8, %v1799_v34, %v1801_v8 }
 0x23a   : > { %1973 = vmatmul.mubr.msk.f32.vlgmr.msra.gmra.mrb[0].mxu1 %vm314_vm3, %v1131_v19  ;;  %v1805_v38 = vmul.f32 %v1803_v37, %v2298_v25 }
 0x23b   : > { %1474 = vmatpush1.msra.mxu1 %v2324_v42  ;;  %1537 = vmatprep.mubr.f32.mxu1 %v2042_v0  ;;  %v1804_v42 = vmul.f32 %v1802_v40, %v2309_v31 }
 0x23c   : > { %1557 = vmatprep.subr.mxu1 %v1553_v20 }
 0x241   : > { %v1885_v25 = vpop.permute.xlu0 %1884 }
 0x242   : > { %1974 = vmatmul.mubr.msk.f32.vlgmr.msra.gmra.mrb[0].mxu1 %vm314_vm3, %v1132_v26 }
 0x243   : > { %1558 = vmatpush1.msra.mxu1 %v1552_v52  ;;  %1621 = vmatprep.mubr.f32.mxu1 %v2042_v0 }
 0x244   : > { %1641 = vmatprep.subr.mxu1 %v1637_v27 }
 0x24a   : > { %1975 = vmatmul.mubr.msk.f32.vlgmr.msra.gmra.mrb[0].mxu1 %vm314_vm3, %v1133_v59 }
 0x24b   : > { %1642 = vmatpush1.msra.mxu1 %v1636_v61  ;;  %1705 = vmatprep.mubr.f32.mxu1 %v2042_v0 }
 0x24c   : > { %1725 = vmatprep.subr.mxu1 %v1721_v33 }
 0x252   : > { %1976 = vmatmul.mubr.msk.f32.vlgmr.msra.gmra.mrb[0].mxu1 %vm314_vm3, %v1134_v6 }
 0x253   : > { %1726 = vmatpush1.msra.mxu1 %v1720_v11  ;;  %1789 = vmatprep.mubr.f32.mxu1 %v2042_v0 }
 0x254   : > { %1809 = vmatprep.subr.mxu1 %v1805_v38 }
 0x25a   : > { %1977 = vmatmul.mubr.msk.f32.vlgmr.msra.gmra.mrb[0].mxu1 %vm314_vm3, %v1135_v41 }
 0x25b   : > { %1810 = vmatpush1.msra.mxu1 %v1804_v42  ;;  %1873 = vmatprep.mubr.f32.mxu1 %v2042_v0 }
 0x262   : > { %1978 = vmatmul.mubr.msk.f32.vlgmr.msra.gmra.mrb[0].mxu1 %vm314_vm3, %v1136_v23 }
 0x335   : > { %v1875_v7 = vpop.f32.mrb[0].mxu1 }
 0x336   : > { %v1887_v43 = vadd.f32 %v1885_v25, %v1875_v7  ;;  %v1877_v44 = vpop.f32.mrb[1].mxu1 }
 0x337   : > { %v1888_v46 = vadd.f32 %v1885_v25, %v1877_v44 }
 0x338   : > { %vm1889_vm11 = vcmp.ge.f32.partialorder %v1887_v43, 0.0  ;;  %v1891_v31 = vmul.f32 0.1, %v1887_v43 }
 0x339   : > { %vm1890_vm12 = vcmp.ge.f32.partialorder %v1888_v46, 0.0  ;;  %v1892_v0 = vmul.f32 0.1, %v1888_v46 }
 0x33a   : > { %v1893_v47 = vsel %vm1889_vm11, %v1887_v43, %v1891_v31 }
 0x33b   : > { %1895 = vst [vmem:[%s251_s28] sm:$0xff] %v1893_v47  ;;  %v1894_v48 = vsel %vm1890_vm12, %v1888_v46, %v1892_v0 }
 0x33c   : > { %1896 = vst [vmem:[%s251_s28 + $0x8] sm:$0xff] %v1894_v48 }
 0x33d PF: > { %s16_s21 = sadd.s32 1, %s2040_s21  }
 0x33e   : > { %p13_p4 = scmp.ge.s32.totalorder %s16_s21, 4  }
 0x340   :  { %15 = sbr.rel (!%p13_p4) target bundleno = 1 (0x1), region = 74 }

</bundles_post_ra>
